<compile_context>
chip_gen: v7x
topology: tpu7x:2x2x1
jax: 0.10.0
libtpu: 0.0.40
codegen_flags: <defaults>
</compile_context>

<pallas_src>
import functools

import jax
import jax.numpy as jnp
from jax.experimental import pallas as pl
from jax.experimental.pallas import tpu as pltpu


# ----------------------------------------------------------------------------
# Fused forward kernel
# ----------------------------------------------------------------------------
def tcn_forward_fused(params, x_all, *, apply_bn, eps=1e-5):
  """Whole TCN forward in one pallas_call.

  x_all: (B, L, Cin) float32 (B may be the concatenated orig/pos/neg batch).
  Returns (o: (B, out_n), sig: (B, F)) with F = channel_lst[-1],
  sig = sigmoid(BN_eval(last timestep features)).
  """
  batch, seq_len, c_in = x_all.shape
  m_rows = batch * seq_len
  blocks = params["blocks"]
  feat, out_n = params["lin_w"].shape

  # ---- pack operands (host-side shape-only reshapes + bf16 weight casts) ----
  operands = [x_all.reshape(m_rows, c_in)]        # activations (f32), sample-major rows
  meta = []                                       # static per-block: (dilation, K, has_ds)
  for blk in blocks:
    ksize, in_c, out_c = blk["w1"].shape
    has_ds = blk["w_ds"] is not None
    # im2col weight layout: (K, Cin, Cout) -> (K*Cin, Cout); MXU operands in bf16.
    operands += [blk["w1"].reshape(ksize * in_c, out_c).astype(jnp.bfloat16),
                 blk["b1"].reshape(1, out_c),
                 blk["w2"].reshape(ksize * out_c, out_c).astype(jnp.bfloat16),
                 blk["b2"].reshape(1, out_c)]
    if has_ds:
      operands += [blk["w_ds"].reshape(in_c, out_c).astype(jnp.bfloat16),
                   blk["b_ds"].reshape(1, out_c)]
    meta.append((blk["dilation"], ksize, has_ds))
  # eval-mode BatchNorm folded to a single affine (scale, bias) in f32
  bn = params["bn"]
  bn_scale = bn["gamma"] * jax.lax.rsqrt(bn["var"] + eps)
  bn_bias = bn["beta"] - bn["mean"] * bn_scale
  operands += [bn_scale.reshape(1, feat), bn_bias.reshape(1, feat),
               params["lin_w"].astype(jnp.bfloat16),
               params["lin_b"].reshape(1, out_n)]
  num_in = len(operands)
  meta = tuple(meta)

  def kernel(*refs):
    in_refs = refs[:num_in]
    out_ref = refs[num_in]
    h_scr = refs[num_in + 1]        # (M + L, F) f32 VMEM scratch (see bottom)

    idx = 0
    h = in_refs[idx][...]           # (M, Cin) f32, rows ordered sample-major
    idx += 1

    # Single-column iota: timestep of each row within its sample (1 vreg).
    t_col = jax.lax.broadcasted_iota(jnp.int32, (m_rows, 1), 0) % seq_len

    def shifted(x2d, shift):
      # y[i] = x[i - shift] when the shift stays inside the same sample, else 0
      # (the causal left padding).  Roll runs on the XLU slot, the mask on the
      # VPU — no O(M^2) operators, no MXU work.
      if shift == 0:
        return x2d
      if shift >= seq_len:
        return jnp.zeros_like(x2d)  # this tap only ever sees the zero padding
      rolled = pltpu.roll(x2d, shift=shift, axis=0)      # sublane rotate (wraps)
      return jnp.where(t_col >= shift, rolled, 0.0)      # kill wrap / cross-sample

    def causal_conv(x2d, w_ref, b_ref, dilation, ksize):
      # PyTorch Conv1d(pad=(K-1)*d) + Chomp1d: y[t] = sum_k x[t-(K-1-k)*d] @ w[k] + b
      # im2col: the K causally-shifted copies are concatenated along the lane
      # axis and multiplied by the pre-flattened (K*Cin, Cout) weight — ONE
      # MXU matmul per conv (bf16 operands, f32 accumulation).
      taps = [shifted(x2d, (ksize - 1 - k) * dilation) for k in range(ksize)]
      x_cat = jnp.concatenate(taps, axis=1) if ksize > 1 else taps[0]
      return jnp.dot(x_cat.astype(jnp.bfloat16), w_ref[...],
                     preferred_element_type=jnp.float32) + b_ref[...]

    for (dilation, ksize, has_ds) in meta:
      w1_ref, b1_ref, w2_ref, b2_ref = in_refs[idx:idx + 4]
      idx += 4
      if has_ds:
        wds_ref, bds_ref = in_refs[idx:idx + 2]
        idx += 2
        res = jnp.dot(h.astype(jnp.bfloat16), wds_ref[...],
                      preferred_element_type=jnp.float32) + bds_ref[...]
      else:
        res = h
      out1 = jnp.maximum(causal_conv(h, w1_ref, b1_ref, dilation, ksize), 0.0)
      # dropout1: identity (eval mode)
      out2 = jnp.maximum(causal_conv(out1, w2_ref, b2_ref, dilation, ksize), 0.0)
      # dropout2: identity (eval mode)
      h = jnp.maximum(out2 + res, 0.0)      # all elementwise work stays f32

    # Last timestep of every sample (y1[:, :, -1] in NCL) via a strided sublane
    # read from VMEM scratch (replaces the old (B, M) selection matmul).  The
    # scratch is over-allocated by one sample so the dilated read window stays
    # comfortably in-bounds under conservative slice checks; the extra rows are
    # never read.
    h_scr[pl.ds(0, m_rows), :] = h
    last = h_scr[pl.ds(seq_len - 1, batch, stride=seq_len), :]   # (B, F)

    bn_s_ref, bn_b_ref, lw_ref, lb_ref = in_refs[idx:idx + 4]
    if apply_bn:  # static decision, mirrors `if last.shape[0] == 1: normalized = last`
      norm = last * bn_s_ref[...] + bn_b_ref[...]
    else:
      norm = last
    o = jnp.dot(norm.astype(jnp.bfloat16), lw_ref[...],
                preferred_element_type=jnp.float32) + lb_ref[...]
    sig = jax.nn.sigmoid(norm)
    # One lane-packed output slab => a single store instead of two partial stores.
    out_ref[...] = jnp.concatenate([o, sig], axis=1).astype(out_ref.dtype)

  # Single invocation (no grid): every operand is a whole-array VMEM block, so
  # all weights stay resident and no intermediate touches HBM.
  vmem = lambda: pl.BlockSpec(memory_space=pltpu.MemorySpace.VMEM)
  packed = pl.pallas_call(
      kernel,
      out_shape=jax.ShapeDtypeStruct((batch, out_n + feat), jnp.float32),
      in_specs=[vmem() for _ in range(num_in)],
      out_specs=vmem(),
      scratch_shapes=[pltpu.VMEM((m_rows + seq_len, feat), jnp.float32)],
  )(*operands)
  return packed[:, :out_n], packed[:, out_n:]


# ----------------------------------------------------------------------------
# Model (parameter init + forward), glue in plain JAX
# ----------------------------------------------------------------------------
def init_params(key, c_in, channel_lst, kernel, out_n):
  blocks = []
  in_c = c_in
  for i, out_c in enumerate(channel_lst):
    key, k1, k2, k3, k4, k5, k6 = jax.random.split(key, 7)
    blk = dict(
        dilation=2 ** i,
        w1=0.1 * jax.random.normal(k1, (kernel, in_c, out_c), jnp.float32),
        b1=0.1 * jax.random.normal(k2, (out_c,), jnp.float32),
        w2=0.1 * jax.random.normal(k3, (kernel, out_c, out_c), jnp.float32),
        b2=0.1 * jax.random.normal(k4, (out_c,), jnp.float32),
        w_ds=(0.1 * jax.random.normal(k5, (1, in_c, out_c), jnp.float32)
              if in_c != out_c else None),
        b_ds=(0.1 * jax.random.normal(k6, (out_c,), jnp.float32)
              if in_c != out_c else None),
    )
    blocks.append(blk)
    in_c = out_c
  linear_size = channel_lst[-1]  # wavelet=False
  key, k7, k8 = jax.random.split(key, 3)
  return dict(
      blocks=blocks,
      bn=dict(mean=jnp.zeros((linear_size,), jnp.float32),
              var=jnp.ones((linear_size,), jnp.float32),
              gamma=jnp.ones((linear_size,), jnp.float32),
              beta=jnp.zeros((linear_size,), jnp.float32)),
      lin_w=0.1 * jax.random.normal(k7, (linear_size, out_n), jnp.float32),
      lin_b=0.1 * jax.random.normal(k8, (out_n,), jnp.float32),
  )


def model_forward(params, inputs, positive, negative):
  """Equivalent of TCN.forward: returns (o1, {'orig','pos','neg'} sigmoids).

  The orig/pos/neg passes are batched into one fused kernel call (weights are
  DMA'd once, 1 launch instead of 3x per-layer launches).  Eval-mode BN is a
  per-row affine so batching the passes does not change its result; the
  BN-skip rule follows the per-pass batch size as in the PyTorch code.
  """
  n = inputs.shape[0]
  x_all = jnp.concatenate([inputs, positive, negative], axis=0)  # (3N, L, C)
  o_all, sig_all = tcn_forward_fused(params, x_all, apply_bn=(n > 1))
  o1 = o_all[:n]  # the returned logits come from the `inputs` pass only
  return o1, {"orig": sig_all[:n],
              "pos": sig_all[n:2 * n],
              "neg": sig_all[2 * n:3 * n]}


# ----------------------------------------------------------------------------
if __name__ == "__main__":
  # Small config: c_in=4, l_in=16, channel_lst=[8,16], kernel=2, out_n=3
  N, C_IN, L_IN = 2, 4, 16
  CHANNEL_LST = [8, 16]
  KERNEL = 2
  OUT_N = 3

  root = jax.random.PRNGKey(0)
  kp, ki, kpos, kneg = jax.random.split(root, 4)
  params = init_params(kp, C_IN, CHANNEL_LST, KERNEL, OUT_N)

  # layout: (N, L_in, C_in) — same as the PyTorch call-site layout.
  inputs = jax.random.normal(ki, (N, L_IN, C_IN), jnp.float32)
  positive = jax.random.normal(kpos, (N, L_IN, C_IN), jnp.float32)
  negative = jax.random.normal(kneg, (N, L_IN, C_IN), jnp.float32)

  fwd = jax.jit(functools.partial(model_forward, params))
  o1, embs = fwd(inputs, positive, negative)
  jax.block_until_ready((o1, embs))

  assert o1.shape == (N, OUT_N)
  assert embs["orig"].shape == (N, CHANNEL_LST[-1])
  assert embs["pos"].shape == (N, CHANNEL_LST[-1])
  assert embs["neg"].shape == (N, CHANNEL_LST[-1])
  print("KERNEL_OK")
</pallas_src>

<mosaic_0001>
module attributes {stable_mosaic.version = 11 : i64} {
  func.func @kernel(%arg0: memref<96x4xf32, #tpu.memory_space<vmem>>, %arg1: memref<8x8xbf16, #tpu.memory_space<vmem>>, %arg2: memref<1x8xf32, #tpu.memory_space<vmem>>, %arg3: memref<16x8xbf16, #tpu.memory_space<vmem>>, %arg4: memref<1x8xf32, #tpu.memory_space<vmem>>, %arg5: memref<4x8xbf16, #tpu.memory_space<vmem>>, %arg6: memref<1x8xf32, #tpu.memory_space<vmem>>, %arg7: memref<16x16xbf16, #tpu.memory_space<vmem>>, %arg8: memref<1x16xf32, #tpu.memory_space<vmem>>, %arg9: memref<32x16xbf16, #tpu.memory_space<vmem>>, %arg10: memref<1x16xf32, #tpu.memory_space<vmem>>, %arg11: memref<8x16xbf16, #tpu.memory_space<vmem>>, %arg12: memref<1x16xf32, #tpu.memory_space<vmem>>, %arg13: memref<1x16xf32, #tpu.memory_space<vmem>>, %arg14: memref<1x16xf32, #tpu.memory_space<vmem>>, %arg15: memref<16x3xbf16, #tpu.memory_space<vmem>>, %arg16: memref<1x3xf32, #tpu.memory_space<vmem>>, %arg17: memref<6x19xf32, #tpu.memory_space<vmem>>, %arg18: memref<112x16xf32, #tpu.memory_space<vmem>>) attributes {dimension_semantics = [], scalar_prefetch = 0 : i64, scratch_operands = 1 : i64, tpu.core_type = #tpu.core_type<tc>} {
    %c0 = arith.constant 0 : index
    %c0_0 = arith.constant 0 : index
    %0 = vector.load %arg0[%c0, %c0_0] : memref<96x4xf32, #tpu.memory_space<vmem>>, vector<96x4xf32>
    %1 = tpu.iota {dimensions = array<i32: 0>} : vector<96x1xi32>
    %c16_i32 = arith.constant 16 : i32
    %c0_i32 = arith.constant 0 : i32
    %2 = arith.cmpi eq, %c16_i32, %c0_i32 : i32
    %c1_i32 = arith.constant 1 : i32
    %3 = arith.select %2, %c1_i32, %c16_i32 : i32
    %4 = vector.broadcast %3 : i32 to vector<96x1xi32>
    %5 = arith.remsi %1, %4 : vector<96x1xi32>
    %c0_i32_1 = arith.constant 0 : i32
    %6 = vector.broadcast %c0_i32_1 : i32 to vector<96x1xi32>
    %7 = arith.cmpi ne, %5, %6 : vector<96x1xi32>
    %c0_i32_2 = arith.constant 0 : i32
    %8 = vector.broadcast %c0_i32_2 : i32 to vector<96x1xi32>
    %9 = arith.cmpi slt, %5, %8 : vector<96x1xi32>
    %c0_i32_3 = arith.constant 0 : i32
    %10 = arith.cmpi slt, %3, %c0_i32_3 : i32
    %11 = vector.broadcast %10 : i1 to vector<96x1xi1>
    %12 = vector.broadcast %11 : vector<96x1xi1> to vector<96x1xi1>
    %13 = arith.xori %9, %12 : vector<96x1xi1>
    %14 = arith.andi %13, %7 : vector<96x1xi1>
    %15 = vector.broadcast %3 : i32 to vector<96x1xi32>
    %16 = arith.addi %5, %15 : vector<96x1xi32>
    %17 = arith.select %14, %16, %5 : vector<96x1xi1>, vector<96x1xi32>
    %18 = arith.truncf %0 : vector<96x4xf32> to vector<96x4xbf16>
    %c0_4 = arith.constant 0 : index
    %c0_5 = arith.constant 0 : index
    %19 = vector.load %arg5[%c0_4, %c0_5] : memref<4x8xbf16, #tpu.memory_space<vmem>>, vector<4x8xbf16>
    %cst = arith.constant dense<0.000000e+00> : vector<96x8xf32>
    %20 = tpu.matmul %18, %19, %cst {dimension_numbers = #tpu.dot_dimension_numbers<[1], [0], [0], [1], [0, 0, 1, 1], [], []>} : vector<96x4xbf16>, vector<4x8xbf16>, vector<96x8xf32> -> vector<96x8xf32>
    %c0_6 = arith.constant 0 : index
    %c0_7 = arith.constant 0 : index
    %21 = vector.load %arg6[%c0_6, %c0_7] : memref<1x8xf32, #tpu.memory_space<vmem>>, vector<1x8xf32>
    %22 = vector.broadcast %21 : vector<1x8xf32> to vector<96x8xf32>
    %23 = arith.addf %20, %22 : vector<96x8xf32>
    %c1_i32_8 = arith.constant 1 : i32
    %24 = tpu.dynamic_rotate %0 by %c1_i32_8 dim 0 : vector<96x4xf32>, i32 -> vector<96x4xf32>
    %c1_i32_9 = arith.constant 1 : i32
    %25 = vector.broadcast %c1_i32_9 : i32 to vector<96x1xi32>
    %26 = arith.cmpi sge, %17, %25 : vector<96x1xi32>
    %cst_10 = arith.constant 0.000000e+00 : f32
    %27 = vector.shape_cast %26 : vector<96x1xi1> to vector<96x1xi1>
    %28 = vector.broadcast %27 : vector<96x1xi1> to vector<96x4xi1>
    %29 = vector.broadcast %cst_10 : f32 to vector<96x4xf32>
    %30 = arith.select %28, %24, %29 : vector<96x4xi1>, vector<96x4xf32>
    %31 = tpu.concatenate %30, %0 in 1 : vector<96x4xf32>, vector<96x4xf32> -> vector<96x8xf32>
    %32 = arith.truncf %31 : vector<96x8xf32> to vector<96x8xbf16>
    %c0_11 = arith.constant 0 : index
    %c0_12 = arith.constant 0 : index
    %33 = vector.load %arg1[%c0_11, %c0_12] : memref<8x8xbf16, #tpu.memory_space<vmem>>, vector<8x8xbf16>
    %cst_13 = arith.constant dense<0.000000e+00> : vector<96x8xf32>
    %34 = tpu.matmul %32, %33, %cst_13 {dimension_numbers = #tpu.dot_dimension_numbers<[1], [0], [0], [1], [0, 0, 1, 1], [], []>} : vector<96x8xbf16>, vector<8x8xbf16>, vector<96x8xf32> -> vector<96x8xf32>
    %c0_14 = arith.constant 0 : index
    %c0_15 = arith.constant 0 : index
    %35 = vector.load %arg2[%c0_14, %c0_15] : memref<1x8xf32, #tpu.memory_space<vmem>>, vector<1x8xf32>
    %36 = vector.broadcast %35 : vector<1x8xf32> to vector<96x8xf32>
    %37 = arith.addf %34, %36 : vector<96x8xf32>
    %cst_16 = arith.constant 0.000000e+00 : f32
    %38 = vector.broadcast %cst_16 : f32 to vector<96x8xf32>
    %39 = arith.maximumf %37, %38 : vector<96x8xf32>
    %c1_i32_17 = arith.constant 1 : i32
    %40 = tpu.dynamic_rotate %39 by %c1_i32_17 dim 0 : vector<96x8xf32>, i32 -> vector<96x8xf32>
    %c1_i32_18 = arith.constant 1 : i32
    %41 = vector.broadcast %c1_i32_18 : i32 to vector<96x1xi32>
    %42 = arith.cmpi sge, %17, %41 : vector<96x1xi32>
    %cst_19 = arith.constant 0.000000e+00 : f32
    %43 = vector.shape_cast %42 : vector<96x1xi1> to vector<96x1xi1>
    %44 = vector.broadcast %43 : vector<96x1xi1> to vector<96x8xi1>
    %45 = vector.broadcast %cst_19 : f32 to vector<96x8xf32>
    %46 = arith.select %44, %40, %45 : vector<96x8xi1>, vector<96x8xf32>
    %47 = tpu.concatenate %46, %39 in 1 : vector<96x8xf32>, vector<96x8xf32> -> vector<96x16xf32>
    %48 = arith.truncf %47 : vector<96x16xf32> to vector<96x16xbf16>
    %c0_20 = arith.constant 0 : index
    %c0_21 = arith.constant 0 : index
    %49 = vector.load %arg3[%c0_20, %c0_21] : memref<16x8xbf16, #tpu.memory_space<vmem>>, vector<16x8xbf16>
    %cst_22 = arith.constant dense<0.000000e+00> : vector<96x8xf32>
    %50 = tpu.matmul %48, %49, %cst_22 {dimension_numbers = #tpu.dot_dimension_numbers<[1], [0], [0], [1], [0, 0, 1, 1], [], []>} : vector<96x16xbf16>, vector<16x8xbf16>, vector<96x8xf32> -> vector<96x8xf32>
    %c0_23 = arith.constant 0 : index
    %c0_24 = arith.constant 0 : index
    %51 = vector.load %arg4[%c0_23, %c0_24] : memref<1x8xf32, #tpu.memory_space<vmem>>, vector<1x8xf32>
    %52 = vector.broadcast %51 : vector<1x8xf32> to vector<96x8xf32>
    %53 = arith.addf %50, %52 : vector<96x8xf32>
    %cst_25 = arith.constant 0.000000e+00 : f32
    %54 = vector.broadcast %cst_25 : f32 to vector<96x8xf32>
    %55 = arith.maximumf %53, %54 : vector<96x8xf32>
    %56 = arith.addf %55, %23 : vector<96x8xf32>
    %cst_26 = arith.constant 0.000000e+00 : f32
    %57 = vector.broadcast %cst_26 : f32 to vector<96x8xf32>
    %58 = arith.maximumf %56, %57 : vector<96x8xf32>
    %59 = arith.truncf %58 : vector<96x8xf32> to vector<96x8xbf16>
    %c0_27 = arith.constant 0 : index
    %c0_28 = arith.constant 0 : index
    %60 = vector.load %arg11[%c0_27, %c0_28] : memref<8x16xbf16, #tpu.memory_space<vmem>>, vector<8x16xbf16>
    %cst_29 = arith.constant dense<0.000000e+00> : vector<96x16xf32>
    %61 = tpu.matmul %59, %60, %cst_29 {dimension_numbers = #tpu.dot_dimension_numbers<[1], [0], [0], [1], [0, 0, 1, 1], [], []>} : vector<96x8xbf16>, vector<8x16xbf16>, vector<96x16xf32> -> vector<96x16xf32>
    %c0_30 = arith.constant 0 : index
    %c0_31 = arith.constant 0 : index
    %62 = vector.load %arg12[%c0_30, %c0_31] : memref<1x16xf32, #tpu.memory_space<vmem>>, vector<1x16xf32>
    %63 = vector.broadcast %62 : vector<1x16xf32> to vector<96x16xf32>
    %64 = arith.addf %61, %63 : vector<96x16xf32>
    %c2_i32 = arith.constant 2 : i32
    %65 = tpu.dynamic_rotate %58 by %c2_i32 dim 0 : vector<96x8xf32>, i32 -> vector<96x8xf32>
    %c2_i32_32 = arith.constant 2 : i32
    %66 = vector.broadcast %c2_i32_32 : i32 to vector<96x1xi32>
    %67 = arith.cmpi sge, %17, %66 : vector<96x1xi32>
    %cst_33 = arith.constant 0.000000e+00 : f32
    %68 = vector.shape_cast %67 : vector<96x1xi1> to vector<96x1xi1>
    %69 = vector.broadcast %68 : vector<96x1xi1> to vector<96x8xi1>
    %70 = vector.broadcast %cst_33 : f32 to vector<96x8xf32>
    %71 = arith.select %69, %65, %70 : vector<96x8xi1>, vector<96x8xf32>
    %72 = tpu.concatenate %71, %58 in 1 : vector<96x8xf32>, vector<96x8xf32> -> vector<96x16xf32>
    %73 = arith.truncf %72 : vector<96x16xf32> to vector<96x16xbf16>
    %c0_34 = arith.constant 0 : index
    %c0_35 = arith.constant 0 : index
    %74 = vector.load %arg7[%c0_34, %c0_35] : memref<16x16xbf16, #tpu.memory_space<vmem>>, vector<16x16xbf16>
    %cst_36 = arith.constant dense<0.000000e+00> : vector<96x16xf32>
    %75 = tpu.matmul %73, %74, %cst_36 {dimension_numbers = #tpu.dot_dimension_numbers<[1], [0], [0], [1], [0, 0, 1, 1], [], []>} : vector<96x16xbf16>, vector<16x16xbf16>, vector<96x16xf32> -> vector<96x16xf32>
    %c0_37 = arith.constant 0 : index
    %c0_38 = arith.constant 0 : index
    %76 = vector.load %arg8[%c0_37, %c0_38] : memref<1x16xf32, #tpu.memory_space<vmem>>, vector<1x16xf32>
    %77 = vector.broadcast %76 : vector<1x16xf32> to vector<96x16xf32>
    %78 = arith.addf %75, %77 : vector<96x16xf32>
    %cst_39 = arith.constant 0.000000e+00 : f32
    %79 = vector.broadcast %cst_39 : f32 to vector<96x16xf32>
    %80 = arith.maximumf %78, %79 : vector<96x16xf32>
    %c2_i32_40 = arith.constant 2 : i32
    %81 = tpu.dynamic_rotate %80 by %c2_i32_40 dim 0 : vector<96x16xf32>, i32 -> vector<96x16xf32>
    %c2_i32_41 = arith.constant 2 : i32
    %82 = vector.broadcast %c2_i32_41 : i32 to vector<96x1xi32>
    %83 = arith.cmpi sge, %17, %82 : vector<96x1xi32>
    %cst_42 = arith.constant 0.000000e+00 : f32
    %84 = vector.shape_cast %83 : vector<96x1xi1> to vector<96x1xi1>
    %85 = vector.broadcast %84 : vector<96x1xi1> to vector<96x16xi1>
    %86 = vector.broadcast %cst_42 : f32 to vector<96x16xf32>
    %87 = arith.select %85, %81, %86 : vector<96x16xi1>, vector<96x16xf32>
    %88 = tpu.concatenate %87, %80 in 1 : vector<96x16xf32>, vector<96x16xf32> -> vector<96x32xf32>
    %89 = arith.truncf %88 : vector<96x32xf32> to vector<96x32xbf16>
    %c0_43 = arith.constant 0 : index
    %c0_44 = arith.constant 0 : index
    %90 = vector.load %arg9[%c0_43, %c0_44] : memref<32x16xbf16, #tpu.memory_space<vmem>>, vector<32x16xbf16>
    %cst_45 = arith.constant dense<0.000000e+00> : vector<96x16xf32>
    %91 = tpu.matmul %89, %90, %cst_45 {dimension_numbers = #tpu.dot_dimension_numbers<[1], [0], [0], [1], [0, 0, 1, 1], [], []>} : vector<96x32xbf16>, vector<32x16xbf16>, vector<96x16xf32> -> vector<96x16xf32>
    %c0_46 = arith.constant 0 : index
    %c0_47 = arith.constant 0 : index
    %92 = vector.load %arg10[%c0_46, %c0_47] : memref<1x16xf32, #tpu.memory_space<vmem>>, vector<1x16xf32>
    %93 = vector.broadcast %92 : vector<1x16xf32> to vector<96x16xf32>
    %94 = arith.addf %91, %93 : vector<96x16xf32>
    %cst_48 = arith.constant 0.000000e+00 : f32
    %95 = vector.broadcast %cst_48 : f32 to vector<96x16xf32>
    %96 = arith.maximumf %94, %95 : vector<96x16xf32>
    %97 = arith.addf %96, %64 : vector<96x16xf32>
    %cst_49 = arith.constant 0.000000e+00 : f32
    %98 = vector.broadcast %cst_49 : f32 to vector<96x16xf32>
    %99 = arith.maximumf %97, %98 : vector<96x16xf32>
    %c0_50 = arith.constant 0 : index
    %c0_51 = arith.constant 0 : index
    %100 = vector.load %arg18[%c0_50, %c0_51] : memref<112x16xf32, #tpu.memory_space<vmem>>, vector<96x16xf32>
    tpu.vector_store %arg18[%c0_50, %c0_51], %99 {strides = array<i32>} : memref<112x16xf32, #tpu.memory_space<vmem>>, vector<96x16xf32>,
    %c15 = arith.constant 15 : index
    %c0_52 = arith.constant 0 : index
    %101 = tpu.strided_load %arg18[%c15, %c0_52] {strides = array<i32: 16, 1>} : memref<112x16xf32, #tpu.memory_space<vmem>>, vector<6x16xf32>
    %c0_53 = arith.constant 0 : index
    %c0_54 = arith.constant 0 : index
    %102 = vector.load %arg13[%c0_53, %c0_54] : memref<1x16xf32, #tpu.memory_space<vmem>>, vector<1x16xf32>
    %103 = vector.broadcast %102 : vector<1x16xf32> to vector<6x16xf32>
    %104 = arith.mulf %101, %103 : vector<6x16xf32>
    %c0_55 = arith.constant 0 : index
    %c0_56 = arith.constant 0 : index
    %105 = vector.load %arg14[%c0_55, %c0_56] : memref<1x16xf32, #tpu.memory_space<vmem>>, vector<1x16xf32>
    %106 = vector.broadcast %105 : vector<1x16xf32> to vector<6x16xf32>
    %107 = arith.addf %104, %106 : vector<6x16xf32>
    %108 = arith.truncf %107 : vector<6x16xf32> to vector<6x16xbf16>
    %c0_57 = arith.constant 0 : index
    %c0_58 = arith.constant 0 : index
    %109 = vector.load %arg15[%c0_57, %c0_58] : memref<16x3xbf16, #tpu.memory_space<vmem>>, vector<16x3xbf16>
    %cst_59 = arith.constant dense<0.000000e+00> : vector<6x3xf32>
    %110 = tpu.matmul %108, %109, %cst_59 {dimension_numbers = #tpu.dot_dimension_numbers<[1], [0], [0], [1], [0, 0, 1, 1], [], []>} : vector<6x16xbf16>, vector<16x3xbf16>, vector<6x3xf32> -> vector<6x3xf32>
    %c0_60 = arith.constant 0 : index
    %c0_61 = arith.constant 0 : index
    %111 = vector.load %arg16[%c0_60, %c0_61] : memref<1x3xf32, #tpu.memory_space<vmem>>, vector<1x3xf32>
    %112 = vector.broadcast %111 : vector<1x3xf32> to vector<6x3xf32>
    %113 = arith.addf %110, %112 : vector<6x3xf32>
    %114 = arith.negf %107 : vector<6x16xf32>
    %115 = math.exp %114 : vector<6x16xf32>
    %cst_62 = arith.constant 1.000000e+00 : f32
    %116 = vector.broadcast %cst_62 : f32 to vector<6x16xf32>
    %117 = arith.addf %116, %115 : vector<6x16xf32>
    %118 = arith.divf %116, %117 : vector<6x16xf32>
    %119 = tpu.concatenate %113, %118 in 1 : vector<6x3xf32>, vector<6x16xf32> -> vector<6x19xf32>
    %c0_63 = arith.constant 0 : index
    %c0_64 = arith.constant 0 : index
    %120 = vector.load %arg17[%c0_63, %c0_64] : memref<6x19xf32, #tpu.memory_space<vmem>>, vector<6x19xf32>
    tpu.vector_store %arg17[%c0_63, %c0_64], %119 {strides = array<i32>} : memref<6x19xf32, #tpu.memory_space<vmem>>, vector<6x19xf32>,
    return
  }
}

</mosaic_0001>

<bundles_post_ra>
// kernel: model_forward.1
= control target key start
LH: loop header
LB: loop body
LE: loop exit
PB: predicated region body
PF: predicated region fallthrough
CT: control target
= control target key end

     0   :  { %v69_v7 = vlaneseq  ;;  %vm510_vm0 = vcmask 1043456   ;;  %s1940_s27 = smov 4   ;;  %vm240_vm2 = vcmask 31744   ;;  %vm491_vm4 = vcmask 64512   ;;  %s2683_s0 = inlined_call_operand.vmem [shape: f32[96,4], index: 0, kind: input, shape index: {}]   ;;  %s2684_s1 = inlined_call_operand.vmem [shape: bf16[8,8], index: 1, kind: input, shape index: {}]   ;;  %s2685_s5 = inlined_call_operand.vmem [shape: bf16[4,8], index: 5, kind: input, shape index: {}]   ;;  %s2686_s3 = inlined_call_operand.vmem [shape: bf16[16,8], index: 3, kind: input, shape index: {}]   ;;  %s2687_s2 = inlined_call_operand.vmem [shape: f32[1,8], index: 2, kind: input, shape index: {}]   ;;  %s2688_s11 = inlined_call_operand.vmem [shape: bf16[8,16], index: 11, kind: input, shape index: {}]   ;;  %s2689_s7 = inlined_call_operand.vmem [shape: bf16[16,16], index: 7, kind: input, shape index: {}]   ;;  %s2690_s4 = inlined_call_operand.vmem [shape: f32[1,8], index: 4, kind: input, shape index: {}]   ;;  %s2691_s6 = inlined_call_operand.vmem [shape: f32[1,8], index: 6, kind: input, shape index: {}]   ;;  %s2692_s9 = inlined_call_operand.vmem [shape: bf16[32,16], index: 9, kind: input, shape index: {}]   ;;  %s2693_s8 = inlined_call_operand.vmem [shape: f32[1,16], index: 8, kind: input, shape index: {}]   ;;  %s2694_s15 = inlined_call_operand.vmem [shape: bf16[16,3], index: 15, kind: input, shape index: {}]   ;;  %s2695_s10 = inlined_call_operand.vmem [shape: f32[1,16], index: 10, kind: input, shape index: {}]   ;;  %s2696_s12 = inlined_call_operand.vmem [shape: f32[1,16], index: 12, kind: input, shape index: {}]   ;;  %s2697_s13 = inlined_call_operand.vmem [shape: f32[1,16], index: 13, kind: input, shape index: {}]   ;;  %s2698_s14 = inlined_call_operand.vmem [shape: f32[1,16], index: 14, kind: input, shape index: {}]   ;;  %s2699_s16 = inlined_call_operand.vmem [shape: f32[1,3], index: 16, kind: input, shape index: {}]   ;;  %s2700_s17 = inlined_call_operand.vmem [shape: f32[6,19], index: 17, kind: output, shape index: {}]  }
   0x1   :  { %2702 = sst [smem:[#allocation3_spill]] %s2683_s0  ;;  %vm259_vm10 = vcmask 1041408   ;;  %vm724_vm11 = vcmask 130048  }
   0x2   :  { %2703 = sst [smem:[#allocation4_spill]] %s2684_s1  ;;  %s2704_s26 = sld [smem:[#allocation3_spill]]  ;;  %v2111_v21 = vshrl.u32 %v69_v7, 7 }
   0x3   :  { %s2705_s1 = sld [smem:[#allocation4_spill]] }
   0x4   :  { %vm356_vm1 = vcmp.lt.s32.totalorder %v2111_v21, 1  ;;  %v2123_v26 = vadd.s32 32, %v2111_v21  ;;  %v2126_v27 = vadd.s32 16, %v2111_v21  ;;  %v86_v30 = vand.u32 15, %v2111_v21 }
   0x5   :  { %v2147_v38 = vadd.s32 48, %v2111_v21  ;;  %v2158_v41 = vadd.s32 64, %v2111_v21  ;;  %vm988_vm12 = vcmp.lt.s32.totalorder %v2111_v21, 2 }
   0x6   :  { %v114_v31 = vand.u32 15, %v2123_v26  ;;  %v100_v35 = vand.u32 15, %v2126_v27  ;;  %vm2142_vm3 = vcmp.ge.s32.totalorder %v86_v30, 1  ;;  %vm2501_vm14 = vcmp.ge.s32.totalorder %v86_v30, 2 }
   0x7   :  { %v128_v55 = vand.u32 15, %v2147_v38  ;;  %v142_v59 = vand.u32 15, %v2158_v41 }
   0x8   :  { %v2039_v0 = vld [vmem:[%s2704_s26] sm:$0xff]  ;;  %v2044_v1 = vld [vmem:[%s2704_s26 + $0x8] sm:$0xff]  ;;  %v2049_v2 = vld [vmem:[%s2704_s26 + $0x10] sm:$0xff]  ;;  %vm2151_vm5 = vcmp.ge.s32.totalorder %v114_v31, 1  ;;  %vm2168_vm6 = vcmp.ge.s32.totalorder %v100_v35, 1  ;;  %vm2495_vm13 = vcmp.ge.s32.totalorder %v100_v35, 2 }
   0x9   :  { %v1811_v3 = vpack.i.bf16 %v2044_v1, %v2039_v0  ;;  %v2056_v4 = vld [vmem:[%s2704_s26 + $0x18] sm:$0xff]  ;;  %v2061_v5 = vld [vmem:[%s2704_s26 + $0x20] sm:$0xff]  ;;  %v2066_v6 = vld [vmem:[%s2704_s26 + $0x28] sm:$0xff]  ;;  %v344_v28 = vrot.slane %v2039_v0, 7  ;;  %v345_v32 = vrot.slane %v2044_v1, 7  ;;  %v346_v34 = vrot.slane %v2049_v2, 7 }
   0xa   :  { %v1821_v8 = vpack.i.bf16 %v2066_v6, %v2061_v5  ;;  %v2073_v9 = vld [vmem:[%s2704_s26 + $0x30] sm:$0xff]  ;;  %v2078_v10 = vld [vmem:[%s2704_s26 + $0x38] sm:$0xff]  ;;  %v1816_v11 = vpack.i.bf16 %v2056_v4, %v2049_v2  ;;  %v228_v12 = vpack.c.bf16 %v2066_v6, %v2061_v5  ;;  %v2089_v14 = vld [vmem:[%s2704_s26 + $0x40] sm:$0xff]  ;;  %v349_v17 = vrot.slane %v2066_v6, 7 }
   0xb   :  { %1812 = vrot.lane.b32.xlu0 %v1811_v3, %s1940_s27  ;;  %v1826_v13 = vpack.i.bf16 %v2078_v10, %v2073_v9  ;;  %v2094_v15 = vld [vmem:[%s2704_s26 + $0x48] sm:$0xff]  ;;  %v483_v16 = vld [vmem:[%s2705_s1] sm:$0xf]  ;;  %v348_v18 = vrot.slane %v2061_v5, 7  ;;  %v2104_v19 = vld [vmem:[%s2704_s26 + $0x50] sm:$0xff]  ;;  %v347_v33 = vrot.slane %v2056_v4, 7  ;;  %v366_v47 = vsel %vm356_vm1, %v345_v32, %v346_v34 }
   0xc   :  { %1822 = vrot.lane.b32.xlu1 %v1821_v8, %s1940_s27  ;;  %v2109_v20 = vld [vmem:[%s2704_s26 + $0x58] sm:$0xff]  ;;  %1803 = vmatprep.subr.msk.bf16.mxu1 %vm510_vm0, %v483_v16  ;;  %v512_v22 = vsel %vm510_vm0, %v483_v16, 0  ;;  %v1831_v23 = vpack.i.bf16 %v2094_v15, %v2089_v14  ;;  %v351_v42 = vrot.slane %v2078_v10, 7  ;;  %v350_v43 = vrot.slane %v2073_v9, 7 }
   0xd   :  { %1725 = vmatpush3.bf16.msra.mxu1 %v512_v22  ;;  %v1836_v24 = vpack.i.bf16 %v2109_v20, %v2104_v19  ;;  %v363_v25 = vsel %vm356_vm1, %v348_v18, %v349_v17  ;;  %v355_v29 = vrot.slane %v2109_v20, 7  ;;  %v364_v40 = vsel %vm356_vm1, %v347_v33, %v348_v18 }
   0xe   :  { %v353_v44 = vrot.slane %v2094_v15, 7  ;;  %v352_v45 = vrot.slane %v2089_v14, 7  ;;  %v367_v49 = vsel %vm356_vm1, %v344_v28, %v345_v32  ;;  %v409_v54 = vsel %vm2151_vm5, %v364_v40, 0.0 }
   0xf   :  { %1817 = vrot.lane.b32.xlu0 %v1816_v11, %s1940_s27  ;;  %v368_v36 = vsel %vm356_vm1, %v355_v29, %v344_v28  ;;  %v365_v56 = vsel %vm356_vm1, %v346_v34, %v347_v33  ;;  %v407_v60 = vsel %vm2168_vm6, %v366_v47, 0.0  ;;  %v362_v63 = vsel %vm356_vm1, %v349_v17, %v350_v43  ;;  %v1932_v28 = vld [vmem:[%s2689_s7] sm:$0xff]  }
  0x10   :  { %1827 = vrot.lane.b32.xlu1 %v1826_v13, %s1940_s27  ;;  %v405_v50 = vsel %vm2142_vm3, %v368_v36, 0.0  ;;  %v2191_v13 = vadd.s32 80, %v2111_v21  ;;  %vm2195_vm7 = vcmp.ge.s32.totalorder %v128_v55, 1  ;;  %v354_v17 = vrot.slane %v2104_v19, 7 }
  0x11   :  { %vm2205_vm8 = vcmp.ge.s32.totalorder %v142_v59, 1  ;;  %v411_v47 = vsel %vm2195_vm7, %v362_v63, 0.0  ;;  %vm2518_vm15 = vcmp.ge.s32.totalorder %v128_v55, 2 }
  0x13   :  { %1832 = vrot.lane.b32.xlu0 %v1831_v23, %s1940_s27 }
  0x14   :  { %1837 = vrot.lane.b32.xlu1 %v1836_v24, %s1940_s27 }
  0x7d   :  { %v1813_v46 = vpop.permute.xlu0 %1812 }
  0x7e   :  { %v1815_v51 = vunpack.i.h.bf16 %v1813_v46  ;;  %v1814_v52 = vunpack.i.l.bf16 %v1813_v46  ;;  %v1823_v53 = vpop.permute.xlu1 %1822  ;;  %v361_v46 = vsel %vm356_vm1, %v350_v43, %v351_v42 }
  0x7f   :  { %v1825_v57 = vunpack.i.h.bf16 %v1823_v53  ;;  %v1824_v58 = vunpack.i.l.bf16 %v1823_v53 }
  0x80   :  { %v465_v61 = vsel %vm240_vm2, %v405_v50, %v1814_v52  ;;  %v466_v62 = vsel %vm240_vm2, %v367_v49, %v1815_v51  ;;  %v359_v49 = vsel %vm356_vm1, %v352_v45, %v353_v44 }
  0x81   :  { %v1818_v3 = vpop.permute.xlu0 %1817  ;;  %v477_v7 = vpack.c.bf16 %v466_v62, %v465_v61  ;;  %v469_v8 = vsel %vm240_vm2, %v409_v54, %v1824_v58  ;;  %v470_v11 = vsel %vm240_vm2, %v363_v25, %v1825_v57  ;;  %v360_v25 = vsel %vm356_vm1, %v351_v42, %v352_v45 }
  0x82   :  { %v1820_v16 = vunpack.i.h.bf16 %v1818_v3  ;;  %v1819_v18 = vunpack.i.l.bf16 %v1818_v3  ;;  %v479_v22 = vpack.c.bf16 %v470_v11, %v469_v8  ;;  %v1828_v24 = vpop.permute.xlu1 %1827  ;;  %v413_v51 = vsel %vm2205_vm8, %v360_v25, 0.0 }
  0x83   :  { %1726 = vmatprep.mubr.msk.bf16.mxu1 %vm491_vm4, %v477_v7  ;;  %v1830_v34 = vunpack.i.h.bf16 %v1828_v24  ;;  %v1829_v36 = vunpack.i.l.bf16 %v1828_v24  ;;  %v156_v54 = vand.u32 15, %v2191_v13  ;;  %v358_v58 = vsel %vm356_vm1, %v353_v44, %v354_v17 }
  0x84   :  { %v468_v32 = vsel %vm240_vm2, %v365_v56, %v1820_v16  ;;  %v467_v33 = vsel %vm240_vm2, %v407_v60, %v1819_v18  ;;  %v357_v7 = vsel %vm356_vm1, %v354_v17, %v355_v29  ;;  %v226_v18 = vpack.c.bf16 %v2044_v1, %v2039_v0  ;;  %v232_v29 = vld [vmem:[%s2685_s5] sm:$0x3]  ;;  %s1945_s5 = smov 3  }
  0x85   :  { %v478_v40 = vpack.c.bf16 %v468_v32, %v467_v33  ;;  %v1833_v50 = vpop.permute.xlu0 %1832  ;;  %v472_v56 = vsel %vm240_vm2, %v361_v46, %v1830_v34  ;;  %v471_v42 = vsel %vm240_vm2, %v411_v47, %v1829_v36  ;;  %vm2230_vm9 = vcmp.ge.s32.totalorder %v156_v54, 1  ;;  %1802 = vmatprep.subr.msk.bf16.mxu0 %vm259_vm10, %v232_v29  ;;  %v1931_v17 = vld [vmem:[%s2686_s3] sm:$0xff]  }
  0x86   :  { %v1835_v52 = vunpack.i.h.bf16 %v1833_v50  ;;  %v1834_v53 = vunpack.i.l.bf16 %v1833_v50  ;;  %v1838_v57 = vpop.permute.xlu1 %1837  ;;  %v480_v61 = vpack.c.bf16 %v472_v56, %v471_v42  ;;  %v415_v8 = vsel %vm2230_vm9, %v358_v58, 0.0  ;;  %1712 = vmatprep.mubr.msk.bf16.mxu0 %vm240_vm2, %v226_v18  ;;  %v866_v60 = vld [vmem:[%s2688_s11] sm:$0xf] }
  0x87   :  { %1727 = vmatmul.mubr.msk.bf16.vlgmr.msra.gmra.mrb[0].mxu1 %vm491_vm4, %v478_v40  ;;  %v1840_v63 = vunpack.i.h.bf16 %v1838_v57  ;;  %v1839_v3 = vunpack.i.l.bf16 %v1838_v57  ;;  %v227_v24 = vpack.c.bf16 %v2056_v4, %v2049_v2  ;;  %v229_v0 = vpack.c.bf16 %v2078_v10, %v2073_v9  ;;  %v1620_v4 = vld [vmem:[%s2687_s2] ss:$0 sm:$0xff]  ;;  %s1941_s2 = smov 8   ;;  %1804 = vmatprep.subr.msk.bf16.mxu1 %vm510_vm0, %v866_v60 }
  0x88   :  { %1730 = vmatprep.mubr.msk.bf16.mxu1 %vm491_vm4, %v479_v22  ;;  %v474_v43 = vsel %vm240_vm2, %v359_v49, %v1835_v52  ;;  %v473_v45 = vsel %vm240_vm2, %v413_v51, %v1834_v53  ;;  %v261_v22 = vsel %vm259_vm10, %v232_v29, 0  ;;  %v230_v1 = vpack.c.bf16 %v2094_v15, %v2089_v14 }
  0x89   :  { %v481_v62 = vpack.c.bf16 %v474_v43, %v473_v45  ;;  %v476_v44 = vsel %vm240_vm2, %v357_v7, %v1840_v63  ;;  %v475_v11 = vsel %vm240_vm2, %v415_v8, %v1839_v3  ;;  %1711 = vmatpush3.bf16.msra.mxu0 %v261_v22  ;;  %v231_v2 = vpack.c.bf16 %v2109_v20, %v2104_v19 }
  0x8a   :  { %v482_v16 = vpack.c.bf16 %v476_v44, %v475_v11  ;;  %1738 = vmatprep.subr.bf16.mxu0 %v1931_v17 }
  0x8c   :  { %1713 = vmatmul.mubr.msk.bf16.vlgmr.msra.gmra.mrb[0].mxu0 %vm240_vm2, %v227_v24 }
  0x8d   :  { %1739 = vmatpush3.bf16.msra.mxu0 %v1931_v17  ;;  %1716 = vmatprep.mubr.msk.bf16.mxu0 %vm240_vm2, %v228_v12 }
  0x8e   :  { %1766 = vmatprep.subr.bf16.mxu0 %v1932_v28 }
  0x8f   :  { %1731 = vmatmul.mubr.msk.bf16.gmra.mrb[4].mxu1 %vm491_vm4, %v480_v61 }
  0x90   :  { %1734 = vmatprep.mubr.msk.bf16.mxu1 %vm491_vm4, %v481_v62 }
  0x94   :  { %1717 = vmatmul.mubr.msk.bf16.gmra.mrb[4].mxu0 %vm240_vm2, %v229_v0 }
  0x95   :  { %1720 = vmatprep.mubr.msk.bf16.mxu0 %vm240_vm2, %v230_v1 }
  0x97   :  { %1735 = vmatmul.mubr.msk.bf16.gmra.mrb[8].mxu1 %vm491_vm4, %v482_v16 }
  0x9c   :  { %1721 = vmatmul.mubr.msk.bf16.gmra.mrb[8].mxu0 %vm240_vm2, %v231_v2  ;;  %vm2547_vm2 = vcmp.ge.s32.totalorder %v142_v59, 2 }
 0x15a   :  { %v1728_v5 = vpop.f32.mrb[0].mxu1 }
 0x15b   :  { %v557_v6 = vadd.f32 %v1728_v5, %v1620_v4  ;;  %v548_v12 = vpop.f32.mrb[1].mxu1 }
 0x15c   :  { %v549_v9 = vadd.f32 %v1620_v4, %v548_v12  ;;  %v1729_v10 = vpop.f32.mrb[2].mxu1 }
 0x15d   :  { %v597_v25 = vmax.f32 %v557_v6, 0.0  ;;  %v560_v14 = vadd.f32 %v1729_v10, %v1620_v4  ;;  %v551_v15 = vpop.f32.mrb[3].mxu1 }
 0x15e   :  { %v595_v32 = vmax.f32 %v549_v9, 0.0  ;;  %v552_v33 = vadd.f32 %v1620_v4, %v551_v15 }
 0x15f   :  { %v598_v34 = vmax.f32 %v560_v14, 0.0  ;;  %v609_v40 = vrot.slane %v597_v25, 7 }
 0x160   :  { %v596_v36 = vmax.f32 %v552_v33, 0.0  ;;  %v607_v46 = vrot.slane %v595_v32, 7 }
 0x161   :  { %v1846_v19 = vpack.i.bf16 %v598_v34, %v597_v25  ;;  %v610_v20 = vrot.slane %v598_v34, 7 }
 0x162   :  { %v608_v47 = vrot.slane %v596_v36, 7  ;;  %v1841_v49 = vpack.i.bf16 %v596_v36, %v595_v32  ;;  %v1732_v50 = vpop.f32.mrb[4].mxu1 }
 0x163   :  { %v2275_v51 = vsel %vm356_vm1, %v609_v40, %v610_v20  ;;  %v573_v52 = vadd.f32 %v1732_v50, %v1620_v4  ;;  %1847 = vrot.lane.b32.xlu1 %v1846_v19, %s1941_s2  ;;  %v564_v53 = vpop.f32.mrb[5].mxu1 }
 0x164   :  { %v2280_v56 = vsel %vm356_vm1, %v608_v47, %v609_v40  ;;  %v2284_v42 = vsel %vm356_vm1, %v607_v46, %v608_v47  ;;  %v565_v43 = vadd.f32 %v1620_v4, %v564_v53  ;;  %v1733_v45 = vpop.f32.mrb[6].mxu1  ;;  %1842 = vrot.lane.b32.xlu0 %v1841_v49, %s1941_s2 }
 0x165   :  { %v601_v57 = vmax.f32 %v573_v52, 0.0  ;;  %v576_v58 = vadd.f32 %v1733_v45, %v1620_v4  ;;  %v567_v61 = vpop.f32.mrb[7].mxu1 }
 0x166   :  { %v599_v62 = vmax.f32 %v565_v43, 0.0  ;;  %v568_v63 = vadd.f32 %v1620_v4, %v567_v61  ;;  %v2317_v43 = vpop.f32.mrb[0].mxu0 }
 0x167   :  { %v602_v3 = vmax.f32 %v576_v58, 0.0  ;;  %v613_v44 = vrot.slane %v601_v57, 7  ;;  %v2319_v45 = vpop.f32.mrb[1].mxu0 }
 0x168   :  { %v611_v7 = vrot.slane %v599_v62, 7  ;;  %v600_v8 = vmax.f32 %v568_v63, 0.0 }
 0x169   :  { %v1856_v11 = vpack.i.bf16 %v602_v3, %v601_v57  ;;  %v614_v16 = vrot.slane %v602_v3, 7  ;;  %v2321_v57 = vpop.f32.mrb[2].mxu0 }
 0x16a   :  { %v2289_v18 = vsel %vm356_vm1, %v610_v20, %v611_v7  ;;  %v612_v29 = vrot.slane %v600_v8, 7  ;;  %v1851_v22 = vpack.i.bf16 %v600_v8, %v599_v62  ;;  %v1736_v24 = vpop.f32.mrb[8].mxu1  ;;  %v2323_v58 = vpop.f32.mrb[3].mxu0  ;;  %v633_v8 = vsel %vm2168_vm6, %v2280_v56, 0.0 }
 0x16b   :  { %v2293_v17 = vsel %vm356_vm1, %v613_v44, %v614_v16  ;;  %v589_v0 = vadd.f32 %v1736_v24, %v1620_v4  ;;  %1857 = vrot.lane.b32.xlu1 %v1856_v11, %s1941_s2  ;;  %v580_v1 = vpop.f32.mrb[9].mxu1  ;;  %vm1607_vm6 = vcmask 152576  }
 0x16c   :  { %v624_v2 = vsel %vm356_vm1, %v612_v29, %v613_v44  ;;  %v2300_v5 = vsel %vm356_vm1, %v611_v7, %v612_v29  ;;  %v581_v6 = vadd.f32 %v1620_v4, %v580_v1  ;;  %v1737_v12 = vpop.f32.mrb[10].mxu1  ;;  %1852 = vrot.lane.b32.xlu0 %v1851_v22, %s1941_s2 }
 0x16d   :  { %v605_v9 = vmax.f32 %v589_v0, 0.0  ;;  %v592_v10 = vadd.f32 %v1737_v12, %v1620_v4  ;;  %v583_v25 = vpop.f32.mrb[11].mxu1 }
 0x16e   :  { %v603_v14 = vmax.f32 %v581_v6, 0.0  ;;  %v584_v15 = vadd.f32 %v1620_v4, %v583_v25 }
 0x16f   :  { %v606_v32 = vmax.f32 %v592_v10, 0.0  ;;  %v617_v36 = vrot.slane %v605_v9, 7 }
 0x170   :  { %v615_v33 = vrot.slane %v603_v14, 7  ;;  %v604_v34 = vmax.f32 %v584_v15, 0.0 }
 0x171   :  { %v1866_v40 = vpack.i.bf16 %v606_v32, %v605_v9  ;;  %v618_v19 = vrot.slane %v606_v32, 7 }
 0x172   :  { %v2305_v20 = vsel %vm356_vm1, %v614_v16, %v615_v33  ;;  %v616_v47 = vrot.slane %v604_v34, 7  ;;  %v1861_v49 = vpack.i.bf16 %v604_v34, %v603_v14  ;;  %v637_v14 = vsel %vm2195_vm7, %v624_v2, 0.0 }
 0x173   :  { %v619_v50 = vsel %vm356_vm1, %v617_v36, %v618_v19  ;;  %v630_v52 = vsel %vm356_vm1, %v618_v19, %v607_v46  ;;  %1867 = vrot.lane.b32.xlu1 %v1866_v40, %s1941_s2  ;;  %v2325_v46 = vpop.f32.mrb[4].mxu0 }
 0x174   :  { %v620_v4 = vsel %vm356_vm1, %v616_v47, %v617_v36  ;;  %v621_v53 = vsel %vm356_vm1, %v615_v33, %v616_v47  ;;  %1862 = vrot.lane.b32.xlu0 %v1861_v49, %s1941_s2  ;;  %v2327_v7 = vpop.f32.mrb[5].mxu0  ;;  %v631_v24 = vsel %vm2142_vm3, %v630_v52, 0.0  ;;  %v635_v36 = vsel %vm2151_vm5, %v2289_v18, 0.0 }
 0x175   :  { %v2332_v16 = vpop.f32.mrb[6].mxu0  ;;  %v641_v39 = vsel %vm2230_vm9, %v620_v4, 0.0  ;;  %v2394_v4 = vld [vmem:[%s2691_s6] ss:$0 sm:$0xff]  ;;  %vm2541_vm1 = vcmp.ge.s32.totalorder %v156_v54, 2  ;;  %vm1366_vm3 = vcmask 261120  }
 0x176   :  { %v2339_v0 = vpop.f32.mrb[7].mxu0  ;;  %vm1605_vm5 = vcmask 23552  }
 0x177   :  { %v2346_v9 = vpop.f32.mrb[8].mxu0 }
 0x178   :  { %v2348_v25 = vpop.f32.mrb[9].mxu0 }
 0x1d5   :  { %v1848_v61 = vpop.permute.xlu1 %1847 }
 0x1d6   :  { %v1850_v62 = vunpack.i.h.bf16 %v1848_v61  ;;  %v1849_v63 = vunpack.i.l.bf16 %v1848_v61  ;;  %v1843_v3 = vpop.permute.xlu0 %1842 }
 0x1d7   :  { %v1845_v44 = vunpack.i.h.bf16 %v1843_v3  ;;  %v1844_v11 = vunpack.i.l.bf16 %v1843_v3  ;;  %v639_v3 = vsel %vm2205_vm8, %v2305_v20, 0.0  ;;  %v2389_v20 = vld [vmem:[%s2690_s4] ss:$0 sm:$0xff] }
 0x1d8   :  { %v693_v29 = vsel %vm491_vm4, %v633_v8, %v1849_v63  ;;  %v694_v22 = vsel %vm491_vm4, %v2275_v51, %v1850_v62 }
 0x1d9   :  { %v704_v1 = vpack.c.bf16 %v694_v22, %v693_v29  ;;  %v691_v6 = vsel %vm491_vm4, %v631_v24, %v1844_v11  ;;  %v692_v48 = vsel %vm491_vm4, %v2284_v42, %v1845_v44  ;;  %v2352_v42 = vpop.f32.mrb[10].mxu0 }
 0x1da   :  { %v703_v56 = vpack.c.bf16 %v692_v48, %v691_v6  ;;  %v2360_v40 = vpop.f32.mrb[11].mxu0  ;;  %v306_v48 = vadd.f32 %v2317_v43, %v2394_v4 }
 0x1dc   :  { %1740 = vmatprep.mubr.msk.bf16.mxu0 %vm724_vm11, %v703_v56 }
 0x1dd   :  { %v1858_v12 = vpop.permute.xlu1 %1857  ;;  %1741 = vmatmul.mubr.msk.bf16.vlgmr.msra.gmra.mrb[12].mxu0 %vm724_vm11, %v704_v1 }
 0x1de   :  { %v1860_v51 = vunpack.i.h.bf16 %v1858_v12  ;;  %v1859_v37 = vunpack.i.l.bf16 %v1858_v12  ;;  %v1853_v10 = vpop.permute.xlu0 %1852  ;;  %1767 = vmatpush3.bf16.msra.mxu0 %v1932_v28 }
 0x1df   :  { %v1855_v15 = vunpack.i.h.bf16 %v1853_v10  ;;  %v1854_v32 = vunpack.i.l.bf16 %v1853_v10 }
 0x1e0   :  { %v697_v33 = vsel %vm491_vm4, %v637_v14, %v1859_v37  ;;  %v698_v34 = vsel %vm491_vm4, %v2293_v17, %v1860_v51  ;;  %v298_v37 = vadd.f32 %v2394_v4, %v2319_v45  ;;  %v322_v45 = vadd.f32 %v2325_v46, %v2394_v4 }
 0x1e1   :  { %v706_v19 = vpack.c.bf16 %v698_v34, %v697_v33  ;;  %v696_v23 = vsel %vm491_vm4, %v2300_v5, %v1855_v15  ;;  %v695_v2 = vsel %vm491_vm4, %v635_v36, %v1854_v32  ;;  %v309_v15 = vadd.f32 %v2321_v57, %v2394_v4 }
 0x1e2   :  { %v705_v47 = vpack.c.bf16 %v696_v23, %v695_v2  ;;  %v301_v34 = vadd.f32 %v2394_v4, %v2323_v58  ;;  %v314_v2 = vadd.f32 %v2394_v4, %v2327_v7  ;;  %v317_v58 = vadd.f32 %v2394_v4, %v2339_v0 }
 0x1e4   :  { %1744 = vmatprep.mubr.msk.bf16.mxu0 %vm724_vm11, %v705_v47 }
 0x1e5   :  { %v1868_v49 = vpop.permute.xlu1 %1867  ;;  %1745 = vmatmul.mubr.msk.bf16.gmra.mrb[16].mxu0 %vm724_vm11, %v706_v19 }
 0x1e6   :  { %v1870_v52 = vunpack.i.h.bf16 %v1868_v49  ;;  %v1869_v17 = vunpack.i.l.bf16 %v1868_v49  ;;  %v1863_v61 = vpop.permute.xlu0 %1862 }
 0x1e7   :  { %v1865_v18 = vunpack.i.h.bf16 %v1863_v61  ;;  %v1864_v62 = vunpack.i.l.bf16 %v1863_v61 }
 0x1e8   :  { %v701_v63 = vsel %vm491_vm4, %v641_v39, %v1869_v17  ;;  %v702_v5 = vsel %vm491_vm4, %v619_v50, %v1870_v52  ;;  %v893_v50 = vsel %vm510_vm0, %v866_v60, 0  ;;  %v325_v52 = vadd.f32 %v2332_v16, %v2394_v4 }
 0x1e9   :  { %v708_v8 = vpack.c.bf16 %v702_v5, %v701_v63  ;;  %v700_v44 = vsel %vm491_vm4, %v621_v53, %v1865_v18  ;;  %v699_v11 = vsel %vm491_vm4, %v639_v3, %v1864_v62  ;;  %1753 = vmatpush3.bf16.msra.mxu1 %v893_v50  ;;  %vm2525_vm0 = vcmp.ge.s32.totalorder %v114_v31, 2 }
 0x1ea   :  { %v707_v29 = vpack.c.bf16 %v700_v44, %v699_v11 }
 0x1ec   :  { %1748 = vmatprep.mubr.msk.bf16.mxu0 %vm724_vm11, %v707_v29 }
 0x1ed   :  { %1749 = vmatmul.mubr.msk.bf16.gmra.mrb[20].mxu0 %vm724_vm11, %v708_v8 }
 0x2b0   :  { %v1742_v53 = vpop.f32.mrb[12].mxu0 }
 0x2b1   :  { %v786_v22 = vadd.f32 %v1742_v53, %v2389_v20  ;;  %v777_v24 = vpop.f32.mrb[13].mxu0 }
 0x2b2   :  { %v778_v1 = vadd.f32 %v2389_v20, %v777_v24  ;;  %v1743_v6 = vpop.f32.mrb[14].mxu0 }
 0x2b3   :  { %v826_v56 = vmax.f32 %v786_v22, 0.0  ;;  %v789_v12 = vadd.f32 %v1743_v6, %v2389_v20  ;;  %v780_v51 = vpop.f32.mrb[15].mxu0 }
 0x2b4   :  { %v824_v10 = vmax.f32 %v778_v1, 0.0  ;;  %v781_v14 = vadd.f32 %v2389_v20, %v780_v51 }
 0x2b5   :  { %v838_v32 = vadd.f32 %v826_v56, %v306_v48  ;;  %v827_v33 = vmax.f32 %v789_v12, 0.0 }
 0x2b6   :  { %v836_v36 = vadd.f32 %v824_v10, %v298_v37  ;;  %v825_v43 = vmax.f32 %v781_v14, 0.0  ;;  %v338_v37 = vadd.f32 %v2346_v9, %v2394_v4  ;;  %v330_v10 = vadd.f32 %v2394_v4, %v2348_v25 }
 0x2b7   :  { %v850_v19 = vmax.f32 %v838_v32, 0.0  ;;  %v839_v23 = vadd.f32 %v827_v33, %v309_v15  ;;  %v341_v33 = vadd.f32 %v2352_v42, %v2394_v4 }
 0x2b8   :  { %v2413_v47 = vmax.f32 %v836_v36, 0.0  ;;  %v837_v57 = vadd.f32 %v825_v43, %v301_v34  ;;  %v1746_v49 = vpop.f32.mrb[16].mxu0  ;;  %v333_v34 = vadd.f32 %v2394_v4, %v2360_v40 }
 0x2b9   :  { %v2419_v17 = vmax.f32 %v839_v23, 0.0  ;;  %v802_v61 = vadd.f32 %v1746_v49, %v2389_v20  ;;  %v793_v39 = vpop.f32.mrb[17].mxu0  ;;  %v978_v18 = vrot.slane %v850_v19, 6 }
 0x2ba   :  { %v976_v46 = vrot.slane %v2413_v47, 6  ;;  %v849_v62 = vmax.f32 %v837_v57, 0.0  ;;  %v794_v7 = vadd.f32 %v2389_v20, %v793_v39  ;;  %v1747_v63 = vpop.f32.mrb[18].mxu0 }
 0x2bb   :  { %v861_v5 = vpack.c.bf16 %v2419_v17, %v850_v19  ;;  %v979_v3 = vrot.slane %v2419_v17, 6  ;;  %v830_v16 = vmax.f32 %v802_v61, 0.0  ;;  %v805_v8 = vadd.f32 %v1747_v63, %v2389_v20  ;;  %v796_v0 = vpop.f32.mrb[19].mxu0 }
 0x2bc   :  { %v977_v44 = vrot.slane %v849_v62, 6  ;;  %v828_v11 = vmax.f32 %v794_v7, 0.0  ;;  %v797_v29 = vadd.f32 %v2389_v20, %v796_v0  ;;  %v1876_v60 = vpack.i.bf16 %v2419_v17, %v850_v19 }
 0x2bd   :  { %v842_v50 = vadd.f32 %v830_v16, %v322_v45  ;;  %v831_v28 = vmax.f32 %v805_v8, 0.0  ;;  %v1871_v53 = vpack.i.bf16 %v849_v62, %v2413_v47  ;;  %v860_v22 = vpack.c.bf16 %v849_v62, %v2413_v47 }
 0x2be   :  { %v840_v24 = vadd.f32 %v828_v11, %v314_v2  ;;  %v829_v1 = vmax.f32 %v797_v29, 0.0  ;;  %1877 = vrot.lane.b32.xlu1 %v1876_v60, %s1941_s2  ;;  %v2436_v6 = vsel %vm988_vm12, %v978_v18, %v979_v3  ;;  %v2440_v48 = vsel %vm988_vm12, %v977_v44, %v978_v18 }
 0x2bf   :  { %v854_v56 = vmax.f32 %v842_v50, 0.0  ;;  %v843_v12 = vadd.f32 %v831_v28, %v325_v52  ;;  %1872 = vrot.lane.b32.xlu0 %v1871_v53, %s1941_s2  ;;  %1754 = vmatprep.mubr.msk.bf16.mxu1 %vm491_vm4, %v860_v22  ;;  %v2448_v51 = vsel %vm988_vm12, %v976_v46, %v977_v44 }
 0x2c0   :  { %v852_v14 = vmax.f32 %v840_v24, 0.0  ;;  %v841_v15 = vadd.f32 %v829_v1, %v317_v58  ;;  %1755 = vmatmul.mubr.msk.bf16.vlgmr.msra.gmra.mrb[12].mxu1 %vm491_vm4, %v861_v5  ;;  %v1750_v32 = vpop.f32.mrb[20].mxu0 }
 0x2c1   :  { %v855_v36 = vmax.f32 %v843_v12, 0.0  ;;  %v818_v43 = vadd.f32 %v1750_v32, %v2389_v20  ;;  %v809_v19 = vpop.f32.mrb[21].mxu0  ;;  %v982_v23 = vrot.slane %v854_v56, 6 }
 0x2c2   :  { %v980_v9 = vrot.slane %v852_v14, 6  ;;  %v853_v45 = vmax.f32 %v841_v15, 0.0  ;;  %v810_v25 = vadd.f32 %v2389_v20, %v809_v19  ;;  %v1751_v2 = vpop.f32.mrb[22].mxu0 }
 0x2c3   :  { %v983_v57 = vrot.slane %v855_v36, 6  ;;  %v834_v49 = vmax.f32 %v818_v43, 0.0  ;;  %v821_v52 = vadd.f32 %v1751_v2, %v2389_v20  ;;  %v812_v58 = vpop.f32.mrb[23].mxu0  ;;  %v1886_v61 = vpack.i.bf16 %v855_v36, %v854_v56 }
 0x2c4   :  { %v981_v42 = vrot.slane %v853_v45, 6  ;;  %v832_v39 = vmax.f32 %v810_v25, 0.0  ;;  %v813_v40 = vadd.f32 %v2389_v20, %v812_v58  ;;  %v1881_v4 = vpack.i.bf16 %v853_v45, %v852_v14 }
 0x2c5   :  { %v846_v18 = vadd.f32 %v834_v49, %v338_v37  ;;  %v835_v62 = vmax.f32 %v821_v52, 0.0  ;;  %1887 = vrot.lane.b32.xlu1 %v1886_v61, %s1941_s2  ;;  %v862_v7 = vpack.c.bf16 %v853_v45, %v852_v14  ;;  %v863_v63 = vpack.c.bf16 %v855_v36, %v854_v56 }
 0x2c6   :  { %v844_v5 = vadd.f32 %v832_v39, %v330_v10  ;;  %v833_v16 = vmax.f32 %v813_v40, 0.0  ;;  %1882 = vrot.lane.b32.xlu0 %v1881_v4, %s1941_s2  ;;  %v993_v8 = vsel %vm988_vm12, %v982_v23, %v983_v57  ;;  %v994_v0 = vsel %vm988_vm12, %v981_v42, %v982_v23 }
 0x2c7   :  { %v858_v44 = vmax.f32 %v846_v18, 0.0  ;;  %v847_v11 = vadd.f32 %v835_v62, %v341_v33  ;;  %1758 = vmatprep.mubr.msk.bf16.mxu1 %vm491_vm4, %v862_v7  ;;  %v995_v20 = vsel %vm988_vm12, %v980_v9, %v981_v42  ;;  %v996_v50 = vsel %vm988_vm12, %v979_v3, %v980_v9 }
 0x2c8   :  { %v856_v29 = vmax.f32 %v844_v5, 0.0  ;;  %v845_v60 = vadd.f32 %v833_v16, %v333_v34  ;;  %1759 = vmatmul.mubr.msk.bf16.gmra.mrb[16].mxu1 %vm491_vm4, %v863_v63  ;;  %v1039_v23 = vsel %vm2495_vm13, %v2440_v48, 0.0  ;;  %v1043_v38 = vsel %vm2518_vm15, %v994_v0, 0.0  ;;  %v1650_v5 = vld [vmem:[%s2695_s10] ss:$0 sm:$0xff] }
 0x2c9   :  { %v859_v28 = vmax.f32 %v847_v11, 0.0  ;;  %v986_v24 = vrot.slane %v858_v44, 6  ;;  %v1041_v26 = vsel %vm2525_vm0, %v996_v50, 0.0  ;;  %v1943_v7 = vmov 0.0  }
 0x2ca   :  { %v984_v53 = vrot.slane %v856_v29, 6  ;;  %v857_v22 = vmax.f32 %v845_v60, 0.0  ;;  %1796 = vmatprep.subr.bf16.mxu0 %v1943_v7 }
 0x2cb   :  { %v987_v1 = vrot.slane %v859_v28, 6  ;;  %v1896_v56 = vpack.i.bf16 %v859_v28, %v858_v44  ;;  %v865_v12 = vpack.c.bf16 %v859_v28, %v858_v44 }
 0x2cc   :  { %v985_v37 = vrot.slane %v857_v22, 6  ;;  %v1891_v10 = vpack.i.bf16 %v857_v22, %v856_v29  ;;  %v864_v14 = vpack.c.bf16 %v857_v22, %v856_v29  ;;  %v992_v15 = vsel %vm988_vm12, %v983_v57, %v984_v53 }
 0x2cd   :  { %1897 = vrot.lane.b32.xlu1 %v1896_v56, %s1941_s2  ;;  %v1000_v17 = vsel %vm988_vm12, %v987_v1, %v976_v46  ;;  %v989_v3 = vsel %vm988_vm12, %v986_v24, %v987_v1  ;;  %v1045_v41 = vsel %vm2547_vm2, %v992_v15, 0.0 }
 0x2ce   :  { %1892 = vrot.lane.b32.xlu0 %v1891_v10, %s1941_s2  ;;  %1762 = vmatprep.mubr.msk.bf16.mxu1 %vm491_vm4, %v864_v14  ;;  %v990_v32 = vsel %vm988_vm12, %v985_v37, %v986_v24  ;;  %v991_v33 = vsel %vm988_vm12, %v984_v53, %v985_v37  ;;  %v1037_v30 = vsel %vm2501_vm14, %v1000_v17, 0.0 }
 0x2cf   :  { %v1047_v44 = vsel %vm2541_vm1, %v990_v32, 0.0  ;;  %v1934_v32 = vld [vmem:[%s2692_s9 + $0x8] sm:$0xff]  }
 0x2d0   :  { %1763 = vmatmul.mubr.msk.bf16.gmra.mrb[20].mxu1 %vm491_vm4, %v865_v12 }
 0x330   :  { %v1878_v46 = vpop.permute.xlu1 %1877 }
 0x331   :  { %v1880_v36 = vunpack.i.h.bf16 %v1878_v46  ;;  %v1879_v43 = vunpack.i.l.bf16 %v1878_v46  ;;  %v1873_v19 = vpop.permute.xlu0 %1872 }
 0x332   :  { %v1875_v9 = vunpack.i.h.bf16 %v1873_v19  ;;  %v1874_v27 = vunpack.i.l.bf16 %v1873_v19 }
 0x333   :  { %v1099_v35 = vsel %vm491_vm4, %v1039_v23, %v1879_v43  ;;  %v1100_v45 = vsel %vm491_vm4, %v2436_v6, %v1880_v36 }
 0x334   :  { %v1110_v25 = vpack.c.bf16 %v1100_v45, %v1099_v35  ;;  %v1097_v2 = vsel %vm491_vm4, %v1037_v30, %v1874_v27  ;;  %v1098_v57 = vsel %vm491_vm4, %v2448_v51, %v1875_v9 }
 0x335   :  { %v1109_v49 = vpack.c.bf16 %v1098_v57, %v1097_v2 }
 0x337   :  { %1768 = vmatprep.mubr.msk.bf16.mxu0 %vm724_vm11, %v1109_v49  ;;  %v1888_v52 = vpop.permute.xlu1 %1887 }
 0x338   :  { %v1890_v58 = vunpack.i.h.bf16 %v1888_v52  ;;  %v1889_v61 = vunpack.i.l.bf16 %v1888_v52  ;;  %1769 = vmatmul.mubr.msk.bf16.vlgmr.msra.gmra.mrb[24].mxu0 %vm724_vm11, %v1110_v25  ;;  %v1883_v51 = vpop.permute.xlu0 %1882 }
 0x339   :  { %v1885_v55 = vunpack.i.h.bf16 %v1883_v51  ;;  %v1884_v42 = vunpack.i.l.bf16 %v1883_v51 }
 0x33a   :  { %v1103_v39 = vsel %vm491_vm4, %v1043_v38, %v1889_v61  ;;  %v1104_v40 = vsel %vm491_vm4, %v993_v8, %v1890_v58 }
 0x33b   :  { %v1112_v31 = vpack.c.bf16 %v1104_v40, %v1103_v39  ;;  %v1102_v4 = vsel %vm491_vm4, %v995_v20, %v1885_v55  ;;  %v1101_v18 = vsel %vm491_vm4, %v1041_v26, %v1884_v42 }
 0x33c   :  { %v1111_v62 = vpack.c.bf16 %v1102_v4, %v1101_v18 }
 0x33e   :  { %1772 = vmatprep.mubr.msk.bf16.mxu0 %vm724_vm11, %v1111_v62 }
 0x33f   :  { %v1898_v63 = vpop.permute.xlu1 %1897 }
 0x340   :  { %v1900_v16 = vunpack.i.h.bf16 %v1898_v63  ;;  %v1899_v8 = vunpack.i.l.bf16 %v1898_v63  ;;  %1773 = vmatmul.mubr.msk.bf16.gmra.mrb[28].mxu0 %vm724_vm11, %v1112_v31  ;;  %v1893_v0 = vpop.permute.xlu0 %1892 }
 0x341   :  { %v1895_v13 = vunpack.i.h.bf16 %v1893_v0  ;;  %v1894_v54 = vunpack.i.l.bf16 %v1893_v0 }
 0x342   :  { %v1107_v11 = vsel %vm491_vm4, %v1047_v44, %v1899_v8  ;;  %v1108_v20 = vsel %vm491_vm4, %v989_v3, %v1900_v16  ;;  %v1933_v3 = vld [vmem:[%s2692_s9] sm:$0xff]  }
 0x343   :  { %v1114_v59 = vpack.c.bf16 %v1108_v20, %v1107_v11  ;;  %v1106_v29 = vsel %vm491_vm4, %v991_v33, %v1895_v13  ;;  %v1105_v60 = vsel %vm491_vm4, %v1045_v41, %v1894_v54  ;;  %1780 = vmatprep.subr.bf16.mxu1 %v1933_v3  ;;  %v1642_v33 = vld [vmem:[%s2693_s8] ss:$0 sm:$0xff]  ;;  %s1942_s8 = smov 16   ;;  %vm1944_vm4 = vmmov 0  }
 0x344   :  { %v1113_v50 = vpack.c.bf16 %v1106_v29, %v1105_v60  ;;  %1781 = vmatpush3.bf16.msra.mxu1 %v1933_v3 }
 0x345   :  { %1782 = vmatprep.subr.bf16.mxu1 %v1934_v32 }
 0x346   :  { %1776 = vmatprep.mubr.msk.bf16.mxu0 %vm724_vm11, %v1113_v50 }
 0x348   :  { %1777 = vmatmul.mubr.msk.bf16.gmra.mrb[32].mxu0 %vm724_vm11, %v1114_v59  ;;  %1783 = vmatpush3.bf16.msra.mxu1 %v1934_v32 }
 0x349   :  { %1798 = vmatprep.mubr.msk.bf16.mxu0 %vm1944_vm4, %v1943_v7 }
 0x393   :  { %v1756_v28 = vpop.f32.mrb[12].mxu1 }
 0x394   :  { %v929_v53 = vpop.f32.mrb[13].mxu1 }
 0x395   :  { %v2562_v22 = vpop.f32.mrb[14].mxu1 }
 0x396   :  { %v2564_v24 = vpop.f32.mrb[15].mxu1 }
 0x39b   :  { %v1760_v1 = vpop.f32.mrb[16].mxu1 }
 0x39c   :  { %v945_v56 = vpop.f32.mrb[17].mxu1 }
 0x39d   :  { %v2566_v12 = vpop.f32.mrb[18].mxu1 }
 0x39e   :  { %v2568_v37 = vpop.f32.mrb[19].mxu1 }
 0x3a3   :  { %v1764_v10 = vpop.f32.mrb[20].mxu1 }
 0x3a4   :  { %v961_v14 = vpop.f32.mrb[21].mxu1 }
 0x3a5   :  { %v2570_v15 = vpop.f32.mrb[22].mxu1 }
 0x3a6   :  { %v2572_v17 = vpop.f32.mrb[23].mxu1 }
 0x40b   :  { %v1770_v46 = vpop.f32.mrb[24].mxu0 }
 0x40c   :  { %v1191_v36 = vadd.f32 %v1770_v46, %v1642_v33  ;;  %v1182_v43 = vpop.f32.mrb[25].mxu0 }
 0x40d   :  { %v1183_v19 = vadd.f32 %v1642_v33, %v1182_v43  ;;  %v1771_v23 = vpop.f32.mrb[26].mxu0 }
 0x40e   :  { %v1231_v9 = vmax.f32 %v1191_v36, 0.0  ;;  %v1194_v27 = vadd.f32 %v1771_v23, %v1642_v33  ;;  %v1185_v35 = vpop.f32.mrb[27].mxu0 }
 0x40f   :  { %v1229_v45 = vmax.f32 %v1183_v19, 0.0  ;;  %v1186_v30 = vadd.f32 %v1642_v33, %v1185_v35 }
 0x410   :  { %v1232_v25 = vmax.f32 %v1194_v27, 0.0  ;;  %v1243_v57 = vrot.slane %v1231_v9, 6 }
 0x411   :  { %v1230_v2 = vmax.f32 %v1186_v30, 0.0  ;;  %v1241_v58 = vrot.slane %v1229_v45, 6 }
 0x412   :  { %v1906_v49 = vpack.i.bf16 %v1232_v25, %v1231_v9  ;;  %v1244_v52 = vrot.slane %v1232_v25, 6 }
 0x413   :  { %v1242_v61 = vrot.slane %v1230_v2, 6  ;;  %v1901_v51 = vpack.i.bf16 %v1230_v2, %v1229_v45  ;;  %v1774_v38 = vpop.f32.mrb[28].mxu0 }
 0x414   :  { %v2585_v55 = vsel %vm988_vm12, %v1243_v57, %v1244_v52  ;;  %v1207_v42 = vadd.f32 %v1774_v38, %v1642_v33  ;;  %1907 = vrot.lane.b32.xlu1 %v1906_v49, %s1942_s8  ;;  %v1198_v39 = vpop.f32.mrb[29].mxu0 }
 0x415   :  { %v1262_v40 = vsel %vm988_vm12, %v1242_v61, %v1243_v57  ;;  %v1263_v26 = vsel %vm988_vm12, %v1241_v58, %v1242_v61  ;;  %v1199_v31 = vadd.f32 %v1642_v33, %v1198_v39  ;;  %v1775_v4 = vpop.f32.mrb[30].mxu0  ;;  %1902 = vrot.lane.b32.xlu0 %v1901_v51, %s1942_s8 }
 0x416   :  { %v1235_v18 = vmax.f32 %v1207_v42, 0.0  ;;  %v1210_v62 = vadd.f32 %v1775_v4, %v1642_v33  ;;  %v1201_v63 = vpop.f32.mrb[31].mxu0 }
 0x417   :  { %v1233_v16 = vmax.f32 %v1199_v31, 0.0  ;;  %v1202_v8 = vadd.f32 %v1642_v33, %v1201_v63 }
 0x418   :  { %v1236_v0 = vmax.f32 %v1210_v62, 0.0  ;;  %v1247_v54 = vrot.slane %v1235_v18, 6 }
 0x419   :  { %v1245_v44 = vrot.slane %v1233_v16, 6  ;;  %v1234_v13 = vmax.f32 %v1202_v8, 0.0 }
 0x41a   :  { %v1916_v11 = vpack.i.bf16 %v1236_v0, %v1235_v18  ;;  %v1248_v20 = vrot.slane %v1236_v0, 6 }
 0x41b   :  { %v2595_v41 = vsel %vm988_vm12, %v1244_v52, %v1245_v44  ;;  %v1246_v59 = vrot.slane %v1234_v13, 6  ;;  %v1911_v29 = vpack.i.bf16 %v1234_v13, %v1233_v16  ;;  %v1778_v60 = vpop.f32.mrb[32].mxu0 }
 0x41c   :  { %v1257_v50 = vsel %vm988_vm12, %v1247_v54, %v1248_v20  ;;  %v1223_v28 = vadd.f32 %v1778_v60, %v1642_v33  ;;  %1917 = vrot.lane.b32.xlu1 %v1916_v11, %s1942_s8  ;;  %v1214_v53 = vpop.f32.mrb[33].mxu0 }
 0x41d   :  { %v1258_v1 = vsel %vm988_vm12, %v1246_v59, %v1247_v54  ;;  %v1259_v56 = vsel %vm988_vm12, %v1245_v44, %v1246_v59  ;;  %v1215_v10 = vadd.f32 %v1642_v33, %v1214_v53  ;;  %v1779_v14 = vpop.f32.mrb[34].mxu0  ;;  %1912 = vrot.lane.b32.xlu0 %v1911_v29, %s1942_s8 }
 0x41e   :  { %v1239_v3 = vmax.f32 %v1223_v28, 0.0  ;;  %v1226_v32 = vadd.f32 %v1779_v14, %v1642_v33  ;;  %v1217_v46 = vpop.f32.mrb[35].mxu0 }
 0x41f   :  { %v1237_v36 = vmax.f32 %v1215_v10, 0.0  ;;  %v1218_v43 = vadd.f32 %v1642_v33, %v1217_v46 }
 0x420   :  { %v1240_v19 = vmax.f32 %v1226_v32, 0.0  ;;  %v1251_v27 = vrot.slane %v1239_v3, 6 }
 0x421   :  { %v1249_v23 = vrot.slane %v1237_v36, 6  ;;  %v1238_v9 = vmax.f32 %v1218_v43, 0.0  ;;  %v1935_v43 = vld [vmem:[%s2694_s15] sm:$0xff]  }
 0x422   :  { %v1926_v35 = vpack.i.bf16 %v1240_v19, %v1239_v3  ;;  %v1252_v45 = vrot.slane %v1240_v19, 6  ;;  %1797 = vmatpush3.bf16.msra.mxu0 %v1935_v43  ;;  %v1635_v19 = vld [vmem:[%s2696_s12] ss:$0 sm:$0xff] }
 0x423   :  { %v1256_v30 = vsel %vm988_vm12, %v1248_v20, %v1249_v23  ;;  %v1250_v25 = vrot.slane %v1238_v9, 6  ;;  %v1921_v2 = vpack.i.bf16 %v1238_v9, %v1237_v36 }
 0x424   :  { %v1264_v57 = vsel %vm988_vm12, %v1252_v45, %v1241_v58  ;;  %1927 = vrot.lane.b32.xlu1 %v1926_v35, %s1942_s8  ;;  %v1253_v49 = vsel %vm988_vm12, %v1251_v27, %v1252_v45  ;;  %v1267_v58 = vsel %vm2495_vm13, %v1262_v40, 0.0  ;;  %v1273_v14 = vsel %vm2547_vm2, %v1256_v30, 0.0 }
 0x425   :  { %v1254_v33 = vsel %vm988_vm12, %v1250_v25, %v1251_v27  ;;  %v1255_v52 = vsel %vm988_vm12, %v1249_v23, %v1250_v25  ;;  %1922 = vrot.lane.b32.xlu0 %v1921_v2, %s1942_s8  ;;  %v1265_v21 = vsel %vm2501_vm14, %v1264_v57, 0.0  ;;  %v941_v25 = vadd.f32 %v2562_v22, %v1635_v19 }
 0x426   :  { %v933_v57 = vadd.f32 %v1635_v19, %v2564_v24  ;;  %v957_v22 = vadd.f32 %v2566_v12, %v1635_v19  ;;  %v949_v24 = vadd.f32 %v1635_v19, %v2568_v37  ;;  %v973_v12 = vadd.f32 %v2570_v15, %v1635_v19  ;;  %v1659_v15 = vld [vmem:[%s2697_s13] ss:$0 sm:$0xff] }
 0x427   :  { %v965_v37 = vadd.f32 %v1635_v19, %v2572_v17  ;;  %v1660_v17 = vld [vmem:[%s2698_s14] ss:$0 sm:$0xff] }
 0x486   :  { %v1908_v61 = vpop.permute.xlu1 %1907 }
 0x487   :  { %v1910_v51 = vunpack.i.h.bf16 %v1908_v61  ;;  %v1909_v38 = vunpack.i.l.bf16 %v1908_v61  ;;  %v1903_v42 = vpop.permute.xlu0 %1902 }
 0x488   :  { %v1905_v39 = vunpack.i.h.bf16 %v1903_v42  ;;  %v1904_v31 = vunpack.i.l.bf16 %v1903_v42 }
 0x489   :  { %v1327_v4 = vsel %vm724_vm11, %v1267_v58, %v1909_v38  ;;  %v1328_v18 = vsel %vm724_vm11, %v2585_v55, %v1910_v51  ;;  %v1271_v55 = vsel %vm2518_vm15, %v1258_v1, 0.0 }
 0x48a   :  { %v1338_v62 = vpack.c.bf16 %v1328_v18, %v1327_v4  ;;  %v1325_v63 = vsel %vm724_vm11, %v1265_v21, %v1904_v31  ;;  %v1326_v16 = vsel %vm724_vm11, %v1263_v26, %v1905_v39  ;;  %v1269_v26 = vsel %vm2525_vm0, %v2595_v41, 0.0 }
 0x48b   :  { %v1337_v8 = vpack.c.bf16 %v1326_v16, %v1325_v63 }
 0x48d   :  { %1784 = vmatprep.mubr.msk.bf16.mxu1 %vm1366_vm3, %v1337_v8 }
 0x48e   :  { %v1918_v47 = vpop.permute.xlu1 %1917  ;;  %1785 = vmatmul.mubr.msk.bf16.vlgmr.msra.gmra.mrb[24].mxu1 %vm1366_vm3, %v1338_v62 }
 0x48f   :  { %v1920_v40 = vunpack.i.h.bf16 %v1918_v47  ;;  %v1919_v0 = vunpack.i.l.bf16 %v1918_v47  ;;  %v1913_v44 = vpop.permute.xlu0 %1912 }
 0x490   :  { %v1915_v34 = vunpack.i.h.bf16 %v1913_v44  ;;  %v1914_v13 = vunpack.i.l.bf16 %v1913_v44 }
 0x491   :  { %v1331_v54 = vsel %vm724_vm11, %v1271_v55, %v1919_v0  ;;  %v1332_v11 = vsel %vm724_vm11, %v1257_v50, %v1920_v40  ;;  %v1275_v50 = vsel %vm2541_vm1, %v1254_v33, 0.0 }
 0x492   :  { %v1340_v20 = vpack.c.bf16 %v1332_v11, %v1331_v54  ;;  %v1330_v59 = vsel %vm724_vm11, %v1259_v56, %v1915_v34  ;;  %v1329_v29 = vsel %vm724_vm11, %v1269_v26, %v1914_v13 }
 0x493   :  { %v1339_v60 = vpack.c.bf16 %v1330_v59, %v1329_v29 }
 0x495   :  { %1788 = vmatprep.mubr.msk.bf16.mxu1 %vm1366_vm3, %v1339_v60 }
 0x496   :  { %v1928_v48 = vpop.permute.xlu1 %1927  ;;  %1789 = vmatmul.mubr.msk.bf16.gmra.mrb[28].mxu1 %vm1366_vm3, %v1340_v20 }
 0x497   :  { %v1930_v28 = vunpack.i.h.bf16 %v1928_v48  ;;  %v1929_v53 = vunpack.i.l.bf16 %v1928_v48  ;;  %v1923_v1 = vpop.permute.xlu0 %1922 }
 0x498   :  { %v1925_v10 = vunpack.i.h.bf16 %v1923_v1  ;;  %v1924_v6 = vunpack.i.l.bf16 %v1923_v1 }
 0x499   :  { %v1335_v41 = vsel %vm724_vm11, %v1275_v50, %v1929_v53  ;;  %v1336_v56 = vsel %vm724_vm11, %v1253_v49, %v1930_v28 }
 0x49a   :  { %v1342_v3 = vpack.c.bf16 %v1336_v56, %v1335_v41  ;;  %v1334_v32 = vsel %vm724_vm11, %v1255_v52, %v1925_v10  ;;  %v1333_v46 = vsel %vm724_vm11, %v1273_v14, %v1924_v6 }
 0x49b   :  { %v1341_v36 = vpack.c.bf16 %v1334_v32, %v1333_v46 }
 0x49d   :  { %1792 = vmatprep.mubr.msk.bf16.mxu1 %vm1366_vm3, %v1341_v36 }
 0x49e   :  { %1793 = vmatmul.mubr.msk.bf16.gmra.mrb[32].mxu1 %vm1366_vm3, %v1342_v3  ;;  %v1661_v3 = vld [vmem:[%s2699_s16] ss:$0 sm:$0xff] }
 0x561   :  { %v1786_v23 = vpop.f32.mrb[24].mxu1 }
 0x562   :  { %v1419_v9 = vpop.f32.mrb[25].mxu1 }
 0x563   :  { %v1787_v27 = vpop.f32.mrb[26].mxu1 }
 0x564   :  { %v1431_v35 = vadd.f32 %v1787_v27, %v1650_v5  ;;  %v1422_v45 = vpop.f32.mrb[27].mxu1 }
 0x565   :  { %v1423_v30 = vadd.f32 %v1650_v5, %v1422_v45 }
 0x566   :  { %v1469_v2 = vmax.f32 %v1431_v35, 0.0 }
 0x567   :  { %v1467_v49 = vmax.f32 %v1423_v30, 0.0 }
 0x568   :  { %v1481_v33 = vadd.f32 %v1469_v2, %v941_v25 }
 0x569   :  { %v1479_v52 = vadd.f32 %v1467_v49, %v933_v57  ;;  %v1790_v61 = vpop.f32.mrb[28].mxu1 }
 0x56a   :  { %v1493_v51 = vmax.f32 %v1481_v33, 0.0  ;;  %v1435_v38 = vpop.f32.mrb[29].mxu1 }
 0x56b   :  { %v1491_v42 = vmax.f32 %v1479_v52, 0.0  ;;  %v1791_v58 = vpop.f32.mrb[30].mxu1 }
 0x56c   :  { %1505 = vst.msk [vmem:[#allocation2 + $0x18] sm:$0xff] %vm724_vm11, %v1493_v51  ;;  %v1447_v39 = vadd.f32 %v1791_v58, %v1650_v5  ;;  %v1438_v31 = vpop.f32.mrb[31].mxu1 }
 0x56d   :  { %1503 = vst.msk [vmem:[#allocation2 + $0x8] sm:$0xff] %vm724_vm11, %v1491_v42  ;;  %v1439_v4 = vadd.f32 %v1650_v5, %v1438_v31 }
 0x56e   :  { %v1473_v18 = vmax.f32 %v1447_v39, 0.0 }
 0x56f   :  { %v1471_v21 = vmax.f32 %v1439_v4, 0.0 }
 0x570   :  { %v1485_v62 = vadd.f32 %v1473_v18, %v957_v22 }
 0x571   :  { %v1483_v63 = vadd.f32 %v1471_v21, %v949_v24  ;;  %v1794_v16 = vpop.f32.mrb[32].mxu1 }
 0x572   :  { %v1497_v8 = vmax.f32 %v1485_v62, 0.0  ;;  %v1451_v47 = vpop.f32.mrb[33].mxu1 }
 0x573   :  { %v1495_v40 = vmax.f32 %v1483_v63, 0.0  ;;  %v1795_v0 = vpop.f32.mrb[34].mxu1 }
 0x574   :  { %1509 = vst.msk [vmem:[#allocation2 + $0x38] sm:$0xff] %vm724_vm11, %v1497_v8  ;;  %v1463_v44 = vadd.f32 %v1795_v0, %v1650_v5  ;;  %v1454_v55 = vpop.f32.mrb[35].mxu1  ;;  %v1515_v60 = vld [vmem:[#allocation2 + $0xf] ss:$16 sm:$0x3] }
 0x575   :  { %1507 = vst.msk [vmem:[#allocation2 + $0x28] sm:$0xff] %vm724_vm11, %v1495_v40  ;;  %v1455_v34 = vadd.f32 %v1650_v5, %v1454_v55 }
 0x576   :  { %v1477_v13 = vmax.f32 %v1463_v44, 0.0 }
 0x577   :  { %v1475_v54 = vmax.f32 %v1455_v34, 0.0 }
 0x578   :  { %v1489_v11 = vadd.f32 %v1477_v13, %v973_v12 }
 0x579   :  { %v1487_v26 = vadd.f32 %v1475_v54, %v965_v37 }
 0x57a   :  { %v1501_v20 = vmax.f32 %v1489_v11, 0.0 }
 0x57b   :  { %v1499_v59 = vmax.f32 %v1487_v26, 0.0 }
 0x57c   :  { %1513 = vst.msk [vmem:[#allocation2 + $0x58] sm:$0xff] %vm724_vm11, %v1501_v20  ;;  %v1516_v29 = vld [vmem:[#allocation2 + $0xf] ss:$16 sm:$0xc] }
 0x57d   :  { %1511 = vst.msk [vmem:[#allocation2 + $0x48] sm:$0xff] %vm724_vm11, %v1499_v59  ;;  %v1517_v48 = vor.u32 %v1516_v29, %v1515_v60 }
 0x584   :  { %v1518_v28 = vld [vmem:[#allocation2 + $0xf] ss:$16 sm:$0x30] }
 0x585   :  { %v1519_v53 = vor.u32 %v1518_v28, %v1517_v48 }
 0x587   :  { %v1527_v1 = vmul.f32 %v1659_v15, %v1519_v53 }
 0x589   :  { %v1535_v50 = vadd.f32 %v1660_v17, %v1527_v1 }
 0x58b   :  { %v1536_v10 = vpack.c.bf16 %v1535_v50, %v1535_v50  ;;  %v1664_v6 = vmul.f32 -1.442695, %v1535_v50 }
 0x58d   :  { %1799 = vmatmul.mubr.msk.bf16.vlgmr.msra.gmra.mrb[36].mxu0 %vm724_vm11, %v1536_v10  ;;  %1936 = vpow2.f32 %v1664_v6 }
 0x597   :  { %v1937_v41 = vpop.eup %1936 }
 0x598   :  { %v1598_v56 = vadd.f32 1.0, %v1937_v41 }
 0x59a   :  { %1938 = vrcp.f32 %v1598_v56 }
 0x5a4   :  { %v1939_v14 = vpop.eup %1938 }
 0x5a5   :  { %1602 = vrot.lane.b32.xlu0 %v1939_v14, %s1945_s5 }
 0x617   :  { %v1603_v7 = vpop.permute.xlu0 %1602 }
 0x660   :  { %v1589_v32 = vpop.f32.mrb[36].mxu0 }
 0x661   :  { %v1590_v46 = vadd.f32 %v1661_v3, %v1589_v32  ;;  %v1800_v36 = vpop.f32.mrb[37].mxu0 }
 0x662   :  { %v1592_v43 = vpop.f32.mrb[38].mxu0 }
 0x663   :  { %v1606_v5 = vsel %vm1605_vm5, %v1590_v46, %v1603_v7  ;;  %v1801_v19 = vpop.f32.mrb[39].mxu0 }
 0x664   :  { %1608 = vst.msk [vmem:[%s2700_s17] sm:$0x3f] %vm1607_vm6, %v1606_v5 }

</bundles_post_ra>
